<compile_context>
chip_gen: v7x
topology: tpu7x:2x2x1
jax: 0.10.0
libtpu: 0.0.40
codegen_flags: <defaults>
</compile_context>

<pallas_src>
import functools

import jax
import jax.numpy as jnp
from jax.experimental import pallas as pl
from jax.experimental.pallas import tpu as pltpu

EPS = 1e-12

_MAX_BLOCK_BYTES = 8 << 20        # hard cap: ~8 MiB per input block
_MAX_ROW_TILE = 4096
_DEFAULT_VMEM_BYTES = 64 << 20    # conservative fallback (v7x per-TensorCore)


def _tpu_topology():
    """Best-effort (tensorcores_per_chip, per-core VMEM bytes); safe fallback."""
    cores, vmem = 1, _DEFAULT_VMEM_BYTES
    try:
        info = pltpu.get_tpu_info()
        v = getattr(info, "vmem_capacity_bytes", None)
        if v:
            vmem = int(v)
        for attr in ("num_cores", "tensorcores_per_chip", "cores_per_chip",
                     "num_tensorcores"):
            c = getattr(info, attr, None)
            if c:
                cores = int(c)
                break
        else:
            # Heuristic: 64 MiB per-core VMEM => v7x (2 TensorCores / chip).
            cores = 2 if vmem <= (64 << 20) else 1
    except Exception:
        pass  # interpret mode / older jax: stay conservative
    return cores, vmem


def _choose_tiles(R, T, dtype, block_bytes, multi_tc):
    """Pick (row_tile, t_tile): ~block_bytes per input block, (sublane, lane)
    aligned; on multi-TensorCore chips keep >= 2 programs on the parallel row
    axis when R allows.  Block == full dim is always legal."""
    itemsize = jnp.dtype(dtype).itemsize
    sub = 16 if itemsize == 2 else 8            # bf16 packs 2 rows per sublane
    block_elems = max(block_bytes // itemsize, sub * 128)
    max_t = max((block_elems // sub) // 128 * 128, 128)
    t_tile = T if T <= max_t else max_t         # full-T block when it fits
    rows = max(block_elems // t_tile, sub)
    rows = max(rows // sub * sub, sub)
    rows = min(rows, _MAX_ROW_TILE)
    if multi_tc and R >= 2 * sub:
        # Keep >= 2 programs on the parallel row axis (v7x has 2 TensorCores);
        # on single-TC chips this would only add grid-step overhead.
        half = max((((R + 1) // 2) + sub - 1) // sub * sub, sub)
        rows = min(rows, half)
    r_tile = R if rows >= R else rows
    return r_tile, t_tile


def _pick_split(R, T, sub):
    """Fold factor s so (R*s, T/s) gives >= 2 row programs on a multi-TC chip."""
    target = 2 * sub
    s = 1
    while R * s < target and s < 64:
        s *= 2
    if s == 1:
        return 1
    if T % s != 0 or (T // s) < 256:
        return 1
    return s


def _accumulate(x_ref, y_ref, dot_acc, tgt_acc, xx_acc, valid_cols=None):
    x = x_ref[...].astype(jnp.float32)
    y = y_ref[...].astype(jnp.float32)
    if valid_cols is not None:
        col = jax.lax.broadcasted_iota(jnp.int32, x.shape, 1)
        valid = col < valid_cols
        x = jnp.where(valid, x, 0.0)
        y = jnp.where(valid, y, 0.0)
    dot_acc[...] += jnp.sum(x * y, axis=-1, keepdims=True)
    tgt_acc[...] += jnp.sum(y * y, axis=-1, keepdims=True)
    xx_acc[...] += jnp.sum(x * x, axis=-1, keepdims=True)


def _sisdr_kernel(x_ref, y_ref, o_ref, dot_acc, tgt_acc, xx_acc, *, eps, t_rem):
    kT = pl.program_id(1)
    last = pl.num_programs(1) - 1

    @pl.when(kT == 0)
    def _init():
        dot_acc[...] = jnp.zeros_like(dot_acc)
        tgt_acc[...] = jnp.zeros_like(tgt_acc)
        xx_acc[...] = jnp.zeros_like(xx_acc)

    if t_rem == 0:
        # No ragged T edge: every step takes the cheap unmasked path.
        _accumulate(x_ref, y_ref, dot_acc, tgt_acc, xx_acc)
    else:
        # Mask only the last T block; interior steps stay unmasked.
        @pl.when(kT != last)
        def _interior():
            _accumulate(x_ref, y_ref, dot_acc, tgt_acc, xx_acc)

        @pl.when(kT == last)
        def _edge():
            _accumulate(x_ref, y_ref, dot_acc, tgt_acc, xx_acc, valid_cols=t_rem)

    @pl.when(kT == last)
    def _finalize():
        dot = dot_acc[...]
        tgt = tgt_acc[...]
        xx = xx_acc[...]
        alpha = dot / (tgt + eps)
        num = alpha * alpha * tgt                              # ||alpha*y||^2
        # ||alpha*y - x||^2; clamp so cancellation can't go slightly negative.
        den = jnp.maximum(num - 2.0 * alpha * dot + xx, 0.0)
        o_ref[...] = 10.0 * jnp.log10((num + eps) / (den + eps))


def _sisdr_partials_kernel(x_ref, y_ref, dot_out, tgt_out, xx_out,
                           dot_acc, tgt_acc, xx_acc, *, t_rem):
    kT = pl.program_id(1)
    last = pl.num_programs(1) - 1

    @pl.when(kT == 0)
    def _init():
        dot_acc[...] = jnp.zeros_like(dot_acc)
        tgt_acc[...] = jnp.zeros_like(tgt_acc)
        xx_acc[...] = jnp.zeros_like(xx_acc)

    if t_rem == 0:
        _accumulate(x_ref, y_ref, dot_acc, tgt_acc, xx_acc)
    else:
        @pl.when(kT != last)
        def _interior():
            _accumulate(x_ref, y_ref, dot_acc, tgt_acc, xx_acc)

        @pl.when(kT == last)
        def _edge():
            _accumulate(x_ref, y_ref, dot_acc, tgt_acc, xx_acc, valid_cols=t_rem)

    @pl.when(kT == last)
    def _finalize():
        dot_out[...] = dot_acc[...]
        tgt_out[...] = tgt_acc[...]
        xx_out[...] = xx_acc[...]


def _launch(x_rows, y_rows, *, eps, emit_partials, block_bytes, multi_tc,
            vmem_cap):
    R, T = x_rows.shape
    r_tile, t_tile = _choose_tiles(R, T, x_rows.dtype, block_bytes, multi_tc)
    grid = (pl.cdiv(R, r_tile), pl.cdiv(T, t_tile))
    t_rem = T % t_tile

    itemsize = jnp.dtype(x_rows.dtype).itemsize
    in_block_bytes = r_tile * t_tile * itemsize
    # 2 inputs x 2 pipeline buffers x block + scratch/output + margin.
    vmem_limit = int(min(max(4 * in_block_bytes + (16 << 20), 32 << 20),
                         int(0.75 * vmem_cap)))

    cost = pl.CostEstimate(
        flops=6 * R * T,                              # 3 muls + 3 adds / elem
        transcendentals=0 if emit_partials else R,    # one log10 per row
        bytes_accessed=2 * R * T * itemsize + (12 if emit_partials else 4) * R,
    )

    in_specs = [pl.BlockSpec((r_tile, t_tile), lambda i, k: (i, k)),
                pl.BlockSpec((r_tile, t_tile), lambda i, k: (i, k))]
    # Same output block across the T axis -> resident accumulator-style output,
    # stored to HBM only once per row tile.
    if emit_partials:
        kernel = functools.partial(_sisdr_partials_kernel, t_rem=t_rem)
        out_shape = tuple(jax.ShapeDtypeStruct((R, 1), jnp.float32)
                          for _ in range(3))
        out_specs = tuple(pl.BlockSpec((r_tile, 1), lambda i, k: (i, 0))
                          for _ in range(3))
    else:
        kernel = functools.partial(_sisdr_kernel, eps=eps, t_rem=t_rem)
        out_shape = jax.ShapeDtypeStruct((R, 1), jnp.float32)
        out_specs = pl.BlockSpec((r_tile, 1), lambda i, k: (i, 0))

    return pl.pallas_call(
        kernel,
        out_shape=out_shape,
        grid_spec=pltpu.PrefetchScalarGridSpec(
            num_scalar_prefetch=0,
            grid=grid,
            in_specs=in_specs,
            out_specs=out_specs,
            scratch_shapes=[pltpu.VMEM((r_tile, 1), jnp.float32)] * 3,
        ),
        compiler_params=pltpu.CompilerParams(
            dimension_semantics=("parallel", "arbitrary"),
            vmem_limit_bytes=vmem_limit,
        ),
        cost_estimate=cost,
    )(x_rows, y_rows)


def _sisdr_rows(x_rows, y_rows, eps=EPS, split=None, block_bytes=None):
    """Per-row SI-SDR via pallas_call.  x_rows / y_rows: (R, T) arrays."""
    R, T = x_rows.shape
    cores, vmem_cap = _tpu_topology()
    multi_tc = cores >= 2
    if block_bytes is None:
        block_bytes = min(_MAX_BLOCK_BYTES, vmem_cap // 12)
    sub = 16 if jnp.dtype(x_rows.dtype).itemsize == 2 else 8

    if split is None:
        # On a multi-TC chip a tiny R leaves the parallel row axis with one
        # program (one core idle): fold T into extra rows, emit partial sums,
        # and finalize the O(R) scalar tail in plain JAX.
        split = _pick_split(R, T, sub) if (multi_tc and R < 2 * sub) else 1

    if split > 1 and T % split == 0:
        Rs, Ts = R * split, T // split
        dot, tgt, xx = _launch(x_rows.reshape(Rs, Ts), y_rows.reshape(Rs, Ts),
                               eps=eps, emit_partials=True,
                               block_bytes=block_bytes, multi_tc=multi_tc,
                               vmem_cap=vmem_cap)
        dot = dot[:, 0].reshape(R, split).sum(axis=1)
        tgt = tgt[:, 0].reshape(R, split).sum(axis=1)
        xx = xx[:, 0].reshape(R, split).sum(axis=1)
        alpha = dot / (tgt + eps)
        num = alpha * alpha * tgt
        den = jnp.maximum(num - 2.0 * alpha * dot + xx, 0.0)
        return 10.0 * jnp.log10((num + eps) / (den + eps))

    out = _launch(x_rows, y_rows, eps=eps, emit_partials=False,
                  block_bytes=block_bytes, multi_tc=multi_tc,
                  vmem_cap=vmem_cap)
    return out[:, 0]


def sisdr_loss(inputs, targets, batch_mean=True, eps=EPS):
    """JAX/Pallas equivalent of SISDR.forward.

    Args:
        inputs:  (B, T) or (B, C, T)
        targets: same shape as inputs
    Returns:
        scalar if batch_mean else (B,) array
    """
    n_dim = inputs.ndim
    assert n_dim in (2, 3), (
        "Only 2D or 3D tensor is acceptable, but given {}D tensor.".format(n_dim))

    if n_dim == 2:
        B, T = inputs.shape
        loss = _sisdr_rows(inputs.reshape(B, T), targets.reshape(B, T), eps=eps)
        loss = loss.reshape(B)
    else:
        B, C, T = inputs.shape
        loss = _sisdr_rows(inputs.reshape(B * C, T), targets.reshape(B * C, T),
                           eps=eps)
        loss = loss.reshape(B, C).mean(axis=1)  # mean over channels

    if batch_mean:
        loss = loss.mean(axis=0)
    return loss


# ---------------------------------------------------------------------------
# Pure-JAX references (sanity checks).
# ---------------------------------------------------------------------------
def _per_row_ref(x, y, eps=EPS):
    dot = jnp.sum(x * y, axis=-1)
    tgt = jnp.sum(y * y, axis=-1)
    alpha = dot / (tgt + eps)
    num = jnp.sum((alpha[:, None] * y) ** 2, axis=-1) + eps
    den = jnp.sum((alpha[:, None] * y - x) ** 2, axis=-1) + eps
    return 10.0 * jnp.log10(num / den)


def _sisdr_ref(inputs, targets, eps=EPS):
    n_dim = inputs.ndim
    alpha = jnp.sum(inputs * targets, axis=n_dim - 1, keepdims=True) / (
        jnp.sum(targets ** 2, axis=n_dim - 1, keepdims=True) + eps)
    num = jnp.sum((alpha * targets) ** 2, axis=n_dim - 1) + eps
    den = jnp.sum((alpha * targets - inputs) ** 2, axis=n_dim - 1) + eps
    loss = 10.0 * jnp.log10(num / den)
    if n_dim == 3:
        loss = loss.mean(axis=1)
    return loss.mean(axis=0)


if __name__ == "__main__":
    key = jax.random.PRNGKey(0)
    k1, k2, k3, k4, k5, k6 = jax.random.split(key, 6)

    # 3-D case: (batch=2, channels=4, T=16)
    x3 = jax.random.normal(k1, (2, 4, 16), dtype=jnp.float32)
    y3 = jax.random.normal(k2, (2, 4, 16), dtype=jnp.float32)
    out3 = jax.block_until_ready(sisdr_loss(x3, y3, batch_mean=True))
    ref3 = _sisdr_ref(x3, y3)
    assert jnp.allclose(out3, ref3, atol=1e-4, rtol=1e-4), (out3, ref3)

    # 2-D case: (batch=2, T=16)
    x2 = jax.random.normal(k3, (2, 16), dtype=jnp.float32)
    y2 = jax.random.normal(k4, (2, 16), dtype=jnp.float32)
    out2 = jax.block_until_ready(sisdr_loss(x2, y2, batch_mean=True))
    ref2 = _sisdr_ref(x2, y2)
    assert jnp.allclose(out2, ref2, atol=1e-4, rtol=1e-4), (out2, ref2)

    # Partial-sums path (multi-TensorCore small-R split), forced for coverage.
    rows_split = jax.block_until_ready(_sisdr_rows(x2, y2, split=2))
    rows_ref = _per_row_ref(x2, y2)
    assert jnp.allclose(rows_split, rows_ref, atol=1e-4, rtol=1e-4), (
        rows_split, rows_ref)

    # Ragged-T edge path: tiny block budget forces t_tile=128 on T=300 so the
    # gated mask (interior unmasked / last block masked) is exercised.
    xr = jax.random.normal(k5, (8, 300), dtype=jnp.float32)
    yr = jax.random.normal(k6, (8, 300), dtype=jnp.float32)
    rows_edge = jax.block_until_ready(
        _sisdr_rows(xr, yr, block_bytes=8 * 128 * 4))
    rows_edge_ref = _per_row_ref(xr, yr)
    assert jnp.allclose(rows_edge, rows_edge_ref, atol=1e-4, rtol=1e-4), (
        rows_edge, rows_edge_ref)

    print("KERNEL_OK")
</pallas_src>

<mosaic_0001>
module attributes {stable_mosaic.version = 11 : i64} {
  func.func @_sisdr_kernel(%arg0: i32, %arg1: i32, %arg2: memref<8x16xf32, #tpu.memory_space<vmem>>, %arg3: memref<8x16xf32, #tpu.memory_space<vmem>>, %arg4: memref<8x1xf32, #tpu.memory_space<vmem>>, %arg5: memref<8x1xf32, #tpu.memory_space<vmem>>, %arg6: memref<8x1xf32, #tpu.memory_space<vmem>>, %arg7: memref<8x1xf32, #tpu.memory_space<vmem>>) attributes {dimension_semantics = [#tpu.dimension_semantics<parallel>, #tpu.dimension_semantics<arbitrary>], iteration_bounds = array<i64: 1, 1>, scalar_prefetch = 0 : i64, scratch_operands = 3 : i64, tpu.core_type = #tpu.core_type<tc>, window_params = [{transform_indices = @transform_0, window_bounds = array<i64: 8, 16>}, {transform_indices = @transform_1, window_bounds = array<i64: 8, 16>}, {transform_indices = @transform_2, window_bounds = array<i64: 8, 1>}]} {
    %c0_i32 = arith.constant 0 : i32
    %0 = arith.cmpi eq, %arg1, %c0_i32 : i32
    %1 = arith.extui %0 : i1 to i32
    %c0_i32_0 = arith.constant 0 : i32
    %2 = arith.cmpi ne, %1, %c0_i32_0 : i32
    scf.if %2 {
      %cst_20 = arith.constant 0.000000e+00 : f32
      %26 = vector.broadcast %cst_20 : f32 to vector<8x1xf32>
      %c0_21 = arith.constant 0 : index
      %c0_22 = arith.constant 0 : index
      %27 = vector.load %arg5[%c0_21, %c0_22] : memref<8x1xf32, #tpu.memory_space<vmem>>, vector<8x1xf32>
      tpu.vector_store %arg5[%c0_21, %c0_22], %26 {strides = array<i32>} : memref<8x1xf32, #tpu.memory_space<vmem>>, vector<8x1xf32>,
      %cst_23 = arith.constant 0.000000e+00 : f32
      %28 = vector.broadcast %cst_23 : f32 to vector<8x1xf32>
      %c0_24 = arith.constant 0 : index
      %c0_25 = arith.constant 0 : index
      %29 = vector.load %arg6[%c0_24, %c0_25] : memref<8x1xf32, #tpu.memory_space<vmem>>, vector<8x1xf32>
      tpu.vector_store %arg6[%c0_24, %c0_25], %28 {strides = array<i32>} : memref<8x1xf32, #tpu.memory_space<vmem>>, vector<8x1xf32>,
      %cst_26 = arith.constant 0.000000e+00 : f32
      %30 = vector.broadcast %cst_26 : f32 to vector<8x1xf32>
      %c0_27 = arith.constant 0 : index
      %c0_28 = arith.constant 0 : index
      %31 = vector.load %arg7[%c0_27, %c0_28] : memref<8x1xf32, #tpu.memory_space<vmem>>, vector<8x1xf32>
      tpu.vector_store %arg7[%c0_27, %c0_28], %30 {strides = array<i32>} : memref<8x1xf32, #tpu.memory_space<vmem>>, vector<8x1xf32>,
    } else {
    }
    %c0 = arith.constant 0 : index
    %c0_1 = arith.constant 0 : index
    %3 = vector.load %arg2[%c0, %c0_1] : memref<8x16xf32, #tpu.memory_space<vmem>>, vector<8x16xf32>
    %c0_2 = arith.constant 0 : index
    %c0_3 = arith.constant 0 : index
    %4 = vector.load %arg3[%c0_2, %c0_3] : memref<8x16xf32, #tpu.memory_space<vmem>>, vector<8x16xf32>
    %c0_4 = arith.constant 0 : index
    %c0_5 = arith.constant 0 : index
    %5 = vector.load %arg5[%c0_4, %c0_5] : memref<8x1xf32, #tpu.memory_space<vmem>>, vector<8x1xf32>
    %6 = arith.mulf %3, %4 : vector<8x16xf32>
    %cst = arith.constant dense<0.000000e+00> : vector<8xf32>
    %7 = vector.multi_reduction <add>, %6, %cst [1] : vector<8x16xf32> to vector<8xf32>
    %8 = vector.shape_cast %7 : vector<8xf32> to vector<8x1xf32>
    %9 = arith.addf %5, %8 : vector<8x1xf32>
    %c0_6 = arith.constant 0 : index
    %c0_7 = arith.constant 0 : index
    %10 = vector.load %arg5[%c0_6, %c0_7] : memref<8x1xf32, #tpu.memory_space<vmem>>, vector<8x1xf32>
    tpu.vector_store %arg5[%c0_6, %c0_7], %9 {strides = array<i32>} : memref<8x1xf32, #tpu.memory_space<vmem>>, vector<8x1xf32>,
    %c0_8 = arith.constant 0 : index
    %c0_9 = arith.constant 0 : index
    %11 = vector.load %arg6[%c0_8, %c0_9] : memref<8x1xf32, #tpu.memory_space<vmem>>, vector<8x1xf32>
    %12 = arith.mulf %4, %4 : vector<8x16xf32>
    %cst_10 = arith.constant dense<0.000000e+00> : vector<8xf32>
    %13 = vector.multi_reduction <add>, %12, %cst_10 [1] : vector<8x16xf32> to vector<8xf32>
    %14 = vector.shape_cast %13 : vector<8xf32> to vector<8x1xf32>
    %15 = arith.addf %11, %14 : vector<8x1xf32>
    %c0_11 = arith.constant 0 : index
    %c0_12 = arith.constant 0 : index
    %16 = vector.load %arg6[%c0_11, %c0_12] : memref<8x1xf32, #tpu.memory_space<vmem>>, vector<8x1xf32>
    tpu.vector_store %arg6[%c0_11, %c0_12], %15 {strides = array<i32>} : memref<8x1xf32, #tpu.memory_space<vmem>>, vector<8x1xf32>,
    %c0_13 = arith.constant 0 : index
    %c0_14 = arith.constant 0 : index
    %17 = vector.load %arg7[%c0_13, %c0_14] : memref<8x1xf32, #tpu.memory_space<vmem>>, vector<8x1xf32>
    %18 = arith.mulf %3, %3 : vector<8x16xf32>
    %cst_15 = arith.constant dense<0.000000e+00> : vector<8xf32>
    %19 = vector.multi_reduction <add>, %18, %cst_15 [1] : vector<8x16xf32> to vector<8xf32>
    %20 = vector.shape_cast %19 : vector<8xf32> to vector<8x1xf32>
    %21 = arith.addf %17, %20 : vector<8x1xf32>
    %c0_16 = arith.constant 0 : index
    %c0_17 = arith.constant 0 : index
    %22 = vector.load %arg7[%c0_16, %c0_17] : memref<8x1xf32, #tpu.memory_space<vmem>>, vector<8x1xf32>
    tpu.vector_store %arg7[%c0_16, %c0_17], %21 {strides = array<i32>} : memref<8x1xf32, #tpu.memory_space<vmem>>, vector<8x1xf32>,
    %c0_i32_18 = arith.constant 0 : i32
    %23 = arith.cmpi eq, %arg1, %c0_i32_18 : i32
    %24 = arith.extui %23 : i1 to i32
    %c0_i32_19 = arith.constant 0 : i32
    %25 = arith.cmpi ne, %24, %c0_i32_19 : i32
    scf.if %25 {
      %c0_20 = arith.constant 0 : index
      %c0_21 = arith.constant 0 : index
      %26 = vector.load %arg5[%c0_20, %c0_21] : memref<8x1xf32, #tpu.memory_space<vmem>>, vector<8x1xf32>
      %c0_22 = arith.constant 0 : index
      %c0_23 = arith.constant 0 : index
      %27 = vector.load %arg6[%c0_22, %c0_23] : memref<8x1xf32, #tpu.memory_space<vmem>>, vector<8x1xf32>
      %c0_24 = arith.constant 0 : index
      %c0_25 = arith.constant 0 : index
      %28 = vector.load %arg7[%c0_24, %c0_25] : memref<8x1xf32, #tpu.memory_space<vmem>>, vector<8x1xf32>
      %cst_26 = arith.constant 9.99999996E-13 : f32
      %29 = vector.broadcast %cst_26 : f32 to vector<8x1xf32>
      %30 = arith.addf %27, %29 : vector<8x1xf32>
      %31 = arith.divf %26, %30 : vector<8x1xf32>
      %32 = arith.mulf %31, %31 : vector<8x1xf32>
      %33 = arith.mulf %32, %27 : vector<8x1xf32>
      %cst_27 = arith.constant 2.000000e+00 : f32
      %34 = vector.broadcast %cst_27 : f32 to vector<8x1xf32>
      %35 = arith.mulf %34, %31 : vector<8x1xf32>
      %36 = arith.mulf %35, %26 : vector<8x1xf32>
      %37 = arith.subf %33, %36 : vector<8x1xf32>
      %38 = arith.addf %37, %28 : vector<8x1xf32>
      %cst_28 = arith.constant 0.000000e+00 : f32
      %39 = vector.broadcast %cst_28 : f32 to vector<8x1xf32>
      %40 = arith.maximumf %38, %39 : vector<8x1xf32>
      %cst_29 = arith.constant 9.99999996E-13 : f32
      %41 = vector.broadcast %cst_29 : f32 to vector<8x1xf32>
      %42 = arith.addf %33, %41 : vector<8x1xf32>
      %cst_30 = arith.constant 9.99999996E-13 : f32
      %43 = vector.broadcast %cst_30 : f32 to vector<8x1xf32>
      %44 = arith.addf %40, %43 : vector<8x1xf32>
      %45 = arith.divf %42, %44 : vector<8x1xf32>
      %46 = math.log %45 : vector<8x1xf32>
      %cst_31 = arith.constant 0.434294492 : f32
      %47 = vector.broadcast %cst_31 : f32 to vector<8x1xf32>
      %48 = arith.mulf %46, %47 : vector<8x1xf32>
      %cst_32 = arith.constant 1.000000e+01 : f32
      %49 = vector.broadcast %cst_32 : f32 to vector<8x1xf32>
      %50 = arith.mulf %49, %48 : vector<8x1xf32>
      %c0_33 = arith.constant 0 : index
      %c0_34 = arith.constant 0 : index
      %51 = vector.load %arg4[%c0_33, %c0_34] : memref<8x1xf32, #tpu.memory_space<vmem>>, vector<8x1xf32>
      tpu.vector_store %arg4[%c0_33, %c0_34], %50 {strides = array<i32>} : memref<8x1xf32, #tpu.memory_space<vmem>>, vector<8x1xf32>,
    } else {
    }
    return
  }
  func.func @transform_0(%arg0: i32, %arg1: i32) -> (i32, i32) {
    %c0_i32 = arith.constant 0 : i32
    return %arg0, %arg1 : i32, i32
  }
  func.func @transform_1(%arg0: i32, %arg1: i32) -> (i32, i32) {
    %c0_i32 = arith.constant 0 : i32
    return %arg0, %arg1 : i32, i32
  }
  func.func @transform_2(%arg0: i32, %arg1: i32) -> (i32, i32) {
    %c0_i32 = arith.constant 0 : i32
    %c0_i32_0 = arith.constant 0 : i32
    return %arg0, %c0_i32 : i32, i32
  }
}

</mosaic_0001>

<bundles_post_ra>
// kernel: tpu_custom_call.1
= control target key start
LH: loop header
LB: loop body
LE: loop exit
PB: predicated region body
PF: predicated region fallthrough
CT: control target
= control target key end

     0   :  { %7 = vsyncpa [#allocation6], 0  ;;  %s208_s0 = inlined_call_operand.hbm [shape: f32[8,16], index: 0, kind: input, shape index: {}]   ;;  %s209_s1 = inlined_call_operand.hbm [shape: f32[8,16], index: 1, kind: input, shape index: {}]   ;;  %s210_s2 = inlined_call_operand.vmem [shape: f32[8,1], index: 2, kind: output, shape index: {}]  }
   0x1   :  { %8 = vsyncpa [#allocation8], 0  ;;  %s156_s9 = smov [#allocation5]   ;;  %s157_s11 = smov [#allocation7]  }
   0x2   :  { %s15_s10 = sshll.u32 %s156_s9, 4  ;;  %s25_s12 = sshll.u32 %s157_s11, 4  ;;  %s16_s10 = int_to_ptr.vmem [resolvable:$true] %s15_s10  ;;  %s26_s12 = int_to_ptr.vmem [resolvable:$true] %s25_s12 }
   0x3   :  { %s108_s15 = scalar_lea.hbm %s208_s0, 128 }
   0x4   :  { %p109_p0 = scmp.ne.s32.totalorder %s208_s0, %s108_s15  ;;  %p112_p1 = scmp.lt.u32.totalorder %s108_s15, %s208_s0 }
   0x6   :  { %p114_p2 = pnand %p112_p1, %p109_p0 }
   0x8   :  { %117 = shalt.err (!%p114_p2)
}
   0x9   :  { %s118_s20 = scalar_lea.vmem %s16_s10, 128  ;;  %p123_p4 = scmp.lt.s32.totalorder %s16_s10, %s16_s10 }
   0xa   :  { %p119_p3 = scmp.ne.s32.totalorder %s16_s10, %s118_s20  ;;  %p124_p5 = scmp.lt.s32.totalorder %s118_s20, %s118_s20 }
   0xc   :  { %p125_p6 = por %p124_p5, %p123_p4 }
   0xe   :  { %p126_p7 = pnand %p125_p6, %p119_p3 }
  0x10   :  { %129 = shalt.err (!%p126_p7)
}
  0x11   :  { %18 = dma.hbm_to_vmem [thread:$0]  %s208_s0, 128, %s16_s10, [#allocation6]  }
  0x12   :  { %s130_s25 = scalar_lea.hbm %s209_s1, 128 }
  0x13   :  { %p131_p8 = scmp.ne.s32.totalorder %s209_s1, %s130_s25  ;;  %p134_p9 = scmp.lt.u32.totalorder %s130_s25, %s209_s1 }
  0x15   :  { %p136_p10 = pnand %p134_p9, %p131_p8 }
  0x17   :  { %139 = shalt.err (!%p136_p10)
}
  0x18   :  { %s140_s30 = scalar_lea.vmem %s26_s12, 128  ;;  %p145_p12 = scmp.lt.s32.totalorder %s26_s12, %s26_s12 }
  0x19   :  { %p141_p11 = scmp.ne.s32.totalorder %s26_s12, %s140_s30  ;;  %p146_p13 = scmp.lt.s32.totalorder %s140_s30, %s140_s30 }
  0x1b   :  { %p147_p0 = por %p146_p13, %p145_p12 }
  0x1d   :  { %p148_p1 = pnand %p147_p0, %p141_p11 }
  0x1f   :  { %151 = shalt.err (!%p148_p1)
}
  0x20   :  { %28 = dma.hbm_to_vmem [thread:$0]  %s209_s1, 128, %s26_s12, [#allocation8]  }
  0x21   :  { %152 = dma.done.wait [#allocation6], 128  }
  0x22   :  { %153 = vsyncadd [#allocation6], 4294967168 }
  0x23   :  { %154 = dma.done.wait [#allocation8], 128  }
  0x24   :  { %155 = vsyncadd [#allocation8], 4294967168  ;;  %vm39_vm0 = vcmask 7168   ;;  %v158_v0 = vmov 0.0   ;;  %v44_v1 = vld [vmem:[#allocation7] sm:$0xff]  ;;  %vm47_vm1 = vcmask 130048  }
  0x25   :  { %41 = vst.msk [vmem:[#allocation3] sm:$0xff] %vm39_vm0, %v158_v0  ;;  %40 = vst.msk [vmem:[#allocation2] sm:$0xff] %vm39_vm0, %v158_v0  ;;  %v43_v2 = vld [vmem:[#allocation5] sm:$0xff]  ;;  %v55_v3 = vmul.f32 %v44_v1, %v44_v1 }
  0x26   :  { %42 = vst.msk [vmem:[#allocation4] sm:$0xff] %vm39_vm0, %v158_v0  ;;  %v46_v4 = vmul.f32 %v44_v1, %v43_v2  ;;  %v62_v5 = vmul.f32 %v43_v2, %v43_v2 }
  0x27   :  { %v56_v6 = vsel %vm47_vm1, %v55_v3, 0.0 }
  0x28   :  { %v63_v7 = vsel %vm47_vm1, %v62_v5, 0.0  ;;  %57 = vadd.xlane.f32.xlu0 %v56_v6  ;;  %v48_v8 = vsel %vm47_vm1, %v46_v4, 0.0 }
  0x29   :  { %64 = vadd.xlane.f32.xlu1 %v63_v7 }
  0x2c   :  { %49 = vadd.xlane.f32.xlu0 %v48_v8  ;;  %v54_v9 = vld [vmem:[#allocation3] sm:$0xff]  ;;  %v45_v15 = vld [vmem:[#allocation2] sm:$0xff] }
  0x2d   :  { %v61_v10 = vld [vmem:[#allocation4] sm:$0xff] }
  0xb5   :  { %v58_v11 = vpop.xlane.xlu0 %57 }
  0xb6   :  { %v65_v12 = vpop.xlane.xlu1 %64  ;;  %v59_v13 = vadd.f32 %v58_v11, %v54_v9 }
  0xb7   :  { %v66_v14 = vadd.f32 %v65_v12, %v61_v10 }
  0xb8   :  { %60 = vst.msk [vmem:[#allocation3] sm:$0xff] %vm39_vm0, %v59_v13 }
  0xb9   :  { %67 = vst.msk [vmem:[#allocation4] sm:$0xff] %vm39_vm0, %v66_v14  ;;  %v50_v16 = vpop.xlane.xlu0 %49 }
  0xba   :  { %v51_v17 = vadd.f32 %v50_v16, %v45_v15 }
  0xbc   :  { %53 = vst.msk [vmem:[#allocation2] sm:$0xff] %vm39_vm0, %v51_v17 }
  0xbf   :  { %v72_v18 = vld [vmem:[#allocation3] sm:$0xff] }
  0xc0   :  { %v74_v19 = vadd.f32 1e-12, %v72_v18  ;;  %v73_v27 = vld [vmem:[#allocation4] sm:$0xff] }
  0xc2   :  { %102 = vrcp.f32 %v74_v19 }
  0xc3   :  { %v71_v20 = vld [vmem:[#allocation2] sm:$0xff] }
  0xcc   :  { %v103_v21 = vpop.eup %102 }
  0xcd   :  { %v76_v22 = vmul.f32 %v103_v21, %v71_v20 }
  0xcf   :  { %v77_v23 = vmul.f32 %v76_v22, %v76_v22  ;;  %v79_v24 = vmul.f32 2.0, %v76_v22 }
  0xd1   :  { %v80_v25 = vmul.f32 %v79_v24, %v71_v20  ;;  %v78_v26 = vmul.f32 %v77_v23, %v72_v18 }
  0xd3   :  { %v81_v28 = vsub.f32 %v78_v26, %v80_v25  ;;  %v84_v32 = vadd.f32 1e-12, %v78_v26 }
  0xd5   :  { %v82_v29 = vadd.f32 %v81_v28, %v73_v27 }
  0xd7   :  { %v83_v30 = vmax.f32 %v82_v29, 0.0 }
  0xd9   :  { %v85_v31 = vadd.f32 1e-12, %v83_v30 }
  0xdb   :  { %104 = vrcp.f32 %v85_v31 }
  0xe5   :  { %v105_v33 = vpop.eup %104 }
  0xe6   :  { %v87_v34 = vmul.f32 %v105_v33, %v84_v32 }
  0xe8   :  { %106 = vlog2.f32 %v87_v34 }
  0xf2   :  { %v107_v35 = vpop.eup %106 }
  0xf3   :  { %v89_v36 = vmul.f32 0.6931472, %v107_v35 }
  0xf5   :  { %v90_v37 = vmul.f32 0.4342945, %v89_v36 }
  0xf7   :  { %v91_v38 = vmul.f32 10.0, %v90_v37 }
  0xf9   :  { %92 = vst.msk [vmem:[%s210_s2] sm:$0xff] %vm39_vm0, %v91_v38 }
  0xfa   :  { %97 = vsyncpa [#allocation6], 1 }
  0xfb   :  { %98 = vsyncpa [#allocation8], 1 }

</bundles_post_ra>
